<compile_context>
chip_gen: v7x
topology: tpu7x:2x2x1
jax: 0.10.0
libtpu: 0.0.40
codegen_flags: <defaults>
</compile_context>

<pallas_src>
import functools

import jax
import jax.numpy as jnp
from jax.experimental import pallas as pl
from jax.experimental.pallas import tpu as pltpu


def _sublane_multiple(dtype) -> int:
    """Sublane packing multiple for the given dtype (f32->8, bf16->16, int8/fp8->32)."""
    itemsize = jnp.dtype(dtype).itemsize
    if itemsize >= 4:
        return 8
    if itemsize == 2:
        return 16
    return 32


def _norm_kernel(x_ref, alpha_ref, bias_ref, o_ref, *, eps: float, d_model: int):
    # x_ref: (tile_rows, d_model), alpha/bias: (1, d_model)
    x = x_ref[...].astype(jnp.float32)

    # One-pass moments: sum(x) and sum(x*x) are independent lane reductions
    # (can overlap on the XLU).  f32 accumulation throughout.
    s1 = jnp.sum(x, axis=-1, keepdims=True)
    s2 = jnp.sum(x * x, axis=-1, keepdims=True)
    mean = s1 * (1.0 / float(d_model))
    # torch.std: unbiased estimator (divide by N-1). Guard tiny negative from
    # cancellation with max(., 0).
    var = jnp.maximum(s2 - s1 * mean, 0.0) / float(d_model - 1)
    std = jnp.sqrt(var)

    # Exact reciprocal (approx=False) to preserve torch-level accuracy; the
    # kernel is memory-bound so the exact divide is not the limiter.
    inv = pl.reciprocal(std + eps, approx=False)

    alpha = alpha_ref[...].astype(jnp.float32)
    bias = bias_ref[...].astype(jnp.float32)
    o_ref[...] = (alpha * ((x - mean) * inv) + bias).astype(o_ref.dtype)


def norm_pallas(x: jax.Array, alpha: jax.Array, bias: jax.Array,
                eps: float = 1e-6, tile_rows: int | None = None,
                vmem_budget_per_buffer: int = 4 << 20) -> jax.Array:
    orig_shape = x.shape
    d_model = orig_shape[-1]
    assert alpha.shape == (d_model,) and bias.shape == (d_model,)

    rows = 1
    for s in orig_shape[:-1]:
        rows *= s
    x2 = x.reshape(rows, d_model)

    sub = _sublane_multiple(x.dtype)
    row_bytes = d_model * jnp.dtype(x.dtype).itemsize

    if tile_rows is None:
        # Pick the biggest tile that keeps double-buffered in+out comfortably
        # inside VMEM on every generation (incl. v7x's 64 MiB), capped at 1024.
        tile_rows = max(sub, min(1024, vmem_budget_per_buffer // max(row_bytes, 1)))
    # Respect sublane packing and don't exceed the (rounded-up) row count.
    tile_rows = max(sub, (tile_rows // sub) * sub)
    rows_rounded = ((rows + sub - 1) // sub) * sub
    tile_rows = min(tile_rows, rows_rounded)

    alpha2 = alpha.reshape(1, d_model)
    bias2 = bias.reshape(1, d_model)

    kernel = functools.partial(_norm_kernel, eps=eps, d_model=d_model)

    # Ragged last block handled by Pallas: padded reads only affect padded rows
    # (per-row normalization), and their out-of-bounds stores are clipped.
    grid = (pl.cdiv(rows, tile_rows),)

    # TODO(synk): for small / non-128-multiple d_model the lane axis is only
    # partially dense; typical transformer d_model (multiples of 128) is fine.
    out = pl.pallas_call(
        kernel,
        out_shape=jax.ShapeDtypeStruct((rows, d_model), x.dtype),
        grid_spec=pltpu.PrefetchScalarGridSpec(
            num_scalar_prefetch=0,
            grid=grid,
            in_specs=[
                pl.BlockSpec((tile_rows, d_model), lambda i: (i, 0)),
                pl.BlockSpec((1, d_model), lambda i: (0, 0)),
                pl.BlockSpec((1, d_model), lambda i: (0, 0)),
            ],
            out_specs=pl.BlockSpec((tile_rows, d_model), lambda i: (i, 0)),
        ),
        compiler_params=pltpu.CompilerParams(
            dimension_semantics=("parallel",),   # sharded across TCs on v7x
            vmem_limit_bytes=48 << 20,           # > default scoped on v5e/v6e/v7x, < v7x physical
        ),
    )(x2, alpha2, bias2)

    return out.reshape(orig_shape)


def norm_reference(x, alpha, bias, eps=1e-6):
    xf = x.astype(jnp.float32)
    mean = jnp.mean(xf, axis=-1, keepdims=True)
    centered = xf - mean
    var = jnp.sum(centered * centered, axis=-1, keepdims=True) / (x.shape[-1] - 1)
    std = jnp.sqrt(var)
    return (alpha * centered / (std + eps) + bias).astype(x.dtype)


if __name__ == "__main__":
    key = jax.random.PRNGKey(0)
    batch, seq, d_model = 2, 8, 32
    eps = 1e-6

    x = jax.random.normal(key, (batch, seq, d_model), dtype=jnp.float32)
    # Deterministic parameter init matching nn.Parameter(torch.ones/zeros)
    alpha = jnp.ones((d_model,), dtype=jnp.float32)
    bias = jnp.zeros((d_model,), dtype=jnp.float32)

    out = norm_pallas(x, alpha, bias, eps=eps)
    out = jax.block_until_ready(out)

    ref = norm_reference(x, alpha, bias, eps=eps)
    assert out.shape == x.shape and out.dtype == x.dtype
    assert jnp.allclose(out, ref, atol=1e-4, rtol=1e-4), "mismatch vs reference"

    print("KERNEL_OK")
</pallas_src>

<mosaic_0001>
module attributes {stable_mosaic.version = 11 : i64} {
  func.func @_norm_kernel(%arg0: i32, %arg1: memref<16x32xf32, #tpu.memory_space<vmem>>, %arg2: memref<1x32xf32, #tpu.memory_space<vmem>>, %arg3: memref<1x32xf32, #tpu.memory_space<vmem>>, %arg4: memref<16x32xf32, #tpu.memory_space<vmem>>) attributes {dimension_semantics = [#tpu.dimension_semantics<parallel>], iteration_bounds = array<i64: 1>, scalar_prefetch = 0 : i64, scratch_operands = 0 : i64, tpu.core_type = #tpu.core_type<tc>, window_params = [{transform_indices = @transform_0, window_bounds = array<i64: 16, 32>}, {pipeline_mode = #tpu.pipeline_mode<synchronous>, transform_indices = @transform_1, window_bounds = array<i64: 1, 32>}, {pipeline_mode = #tpu.pipeline_mode<synchronous>, transform_indices = @transform_2, window_bounds = array<i64: 1, 32>}, {transform_indices = @transform_3, window_bounds = array<i64: 16, 32>}]} {
    %c0 = arith.constant 0 : index
    %c0_0 = arith.constant 0 : index
    %0 = vector.load %arg1[%c0, %c0_0] : memref<16x32xf32, #tpu.memory_space<vmem>>, vector<16x32xf32>
    %cst = arith.constant dense<0.000000e+00> : vector<16xf32>
    %1 = vector.multi_reduction <add>, %0, %cst [1] : vector<16x32xf32> to vector<16xf32>
    %2 = vector.shape_cast %1 : vector<16xf32> to vector<16x1xf32>
    %3 = arith.mulf %0, %0 : vector<16x32xf32>
    %cst_1 = arith.constant dense<0.000000e+00> : vector<16xf32>
    %4 = vector.multi_reduction <add>, %3, %cst_1 [1] : vector<16x32xf32> to vector<16xf32>
    %5 = vector.shape_cast %4 : vector<16xf32> to vector<16x1xf32>
    %cst_2 = arith.constant 3.125000e-02 : f32
    %6 = vector.broadcast %cst_2 : f32 to vector<16x1xf32>
    %7 = arith.mulf %2, %6 : vector<16x1xf32>
    %8 = arith.mulf %2, %7 : vector<16x1xf32>
    %9 = arith.subf %5, %8 : vector<16x1xf32>
    %cst_3 = arith.constant 0.000000e+00 : f32
    %10 = vector.broadcast %cst_3 : f32 to vector<16x1xf32>
    %11 = arith.maximumf %9, %10 : vector<16x1xf32>
    %cst_4 = arith.constant 3.100000e+01 : f32
    %12 = vector.broadcast %cst_4 : f32 to vector<16x1xf32>
    %13 = arith.divf %11, %12 : vector<16x1xf32>
    %14 = math.sqrt %13 : vector<16x1xf32>
    %cst_5 = arith.constant 9.99999997E-7 : f32
    %15 = vector.broadcast %cst_5 : f32 to vector<16x1xf32>
    %16 = arith.addf %14, %15 : vector<16x1xf32>
    %17 = tpu.reciprocal %16 : vector<16x1xf32> -> vector<16x1xf32>
    %c0_6 = arith.constant 0 : index
    %c0_7 = arith.constant 0 : index
    %18 = vector.load %arg2[%c0_6, %c0_7] : memref<1x32xf32, #tpu.memory_space<vmem>>, vector<1x32xf32>
    %c0_8 = arith.constant 0 : index
    %c0_9 = arith.constant 0 : index
    %19 = vector.load %arg3[%c0_8, %c0_9] : memref<1x32xf32, #tpu.memory_space<vmem>>, vector<1x32xf32>
    %20 = vector.broadcast %7 : vector<16x1xf32> to vector<16x32xf32>
    %21 = arith.subf %0, %20 : vector<16x32xf32>
    %22 = vector.broadcast %17 : vector<16x1xf32> to vector<16x32xf32>
    %23 = arith.mulf %21, %22 : vector<16x32xf32>
    %24 = vector.broadcast %18 : vector<1x32xf32> to vector<16x32xf32>
    %25 = arith.mulf %24, %23 : vector<16x32xf32>
    %26 = vector.broadcast %19 : vector<1x32xf32> to vector<16x32xf32>
    %27 = arith.addf %25, %26 : vector<16x32xf32>
    %c0_10 = arith.constant 0 : index
    %c0_11 = arith.constant 0 : index
    %28 = vector.load %arg4[%c0_10, %c0_11] : memref<16x32xf32, #tpu.memory_space<vmem>>, vector<16x32xf32>
    tpu.vector_store %arg4[%c0_10, %c0_11], %27 {strides = array<i32>} : memref<16x32xf32, #tpu.memory_space<vmem>>, vector<16x32xf32>,
    return
  }
  func.func @transform_0(%arg0: i32) -> (i32, i32) {
    %c0_i32 = arith.constant 0 : i32
    %c0_i32_0 = arith.constant 0 : i32
    return %arg0, %c0_i32 : i32, i32
  }
  func.func @transform_1(%arg0: i32) -> (i32, i32) {
    %c0_i32 = arith.constant 0 : i32
    %c0_i32_0 = arith.constant 0 : i32
    %c0_i32_1 = arith.constant 0 : i32
    return %c0_i32, %c0_i32_0 : i32, i32
  }
  func.func @transform_2(%arg0: i32) -> (i32, i32) {
    %c0_i32 = arith.constant 0 : i32
    %c0_i32_0 = arith.constant 0 : i32
    %c0_i32_1 = arith.constant 0 : i32
    return %c0_i32, %c0_i32_0 : i32, i32
  }
  func.func @transform_3(%arg0: i32) -> (i32, i32) {
    %c0_i32 = arith.constant 0 : i32
    %c0_i32_0 = arith.constant 0 : i32
    return %arg0, %c0_i32 : i32, i32
  }
}

</mosaic_0001>

<bundles_post_ra>
// kernel: tpu_custom_call.1
= control target key start
LH: loop header
LB: loop body
LE: loop exit
PB: predicated region body
PF: predicated region fallthrough
CT: control target
= control target key end

     0   :  { %8 = vsyncpa [#allocation3], 0  ;;  %s244_s0 = inlined_call_operand.hbm [shape: f32[16,32], index: 0, kind: input, shape index: {}]   ;;  %s245_s1 = inlined_call_operand.vmem [shape: f32[1,32], index: 1, kind: input, shape index: {}]   ;;  %s246_s2 = inlined_call_operand.vmem [shape: f32[1,32], index: 2, kind: input, shape index: {}]   ;;  %s247_s3 = inlined_call_operand.hbm [shape: f32[16,32], index: 3, kind: output, shape index: {}]  }
   0x1   :  { %9 = vsyncpa [#allocation4], 0  ;;  %s178_s12 = smov [#allocation2]   ;;  %s130_s16 = scalar_lea.hbm %s244_s0, 256 }
   0x2   :  { %s15_s13 = sshll.u32 %s178_s12, 4  ;;  %p131_p0 = scmp.ne.s32.totalorder %s244_s0, %s130_s16  ;;  %s16_s13 = int_to_ptr.vmem [resolvable:$true] %s15_s13 }
   0x3   :  { %p134_p1 = scmp.lt.u32.totalorder %s130_s16, %s244_s0 }
   0x5   :  { %p136_p2 = pnand %p134_p1, %p131_p0 }
   0x7   :  { %139 = shalt.err (!%p136_p2)
}
   0x8   :  { %s140_s21 = scalar_lea.vmem %s16_s13, 256  ;;  %p145_p4 = scmp.lt.s32.totalorder %s16_s13, %s16_s13 }
   0x9   :  { %p141_p3 = scmp.ne.s32.totalorder %s16_s13, %s140_s21  ;;  %p146_p5 = scmp.lt.s32.totalorder %s140_s21, %s140_s21 }
   0xb   :  { %p147_p6 = por %p146_p5, %p145_p4 }
   0xd   :  { %p148_p7 = pnand %p147_p6, %p141_p3 }
   0xf   :  { %151 = shalt.err (!%p148_p7)
}
  0x10   :  { %s179_s22 = smov 128   ;;  %s180_s23 = smov 8  }
  0x11   :  { %21 = dma.hbm_to_vmem [thread:$0]  %s244_s0, 256, %s16_s13, [#allocation3], %s179_s22, %s179_s22, %s180_s23  }
  0x12   :  { %174 = dma.done.wait [#allocation3], 256  }
  0x13   :  { %175 = vsyncadd [#allocation3], 4294967040  ;;  %vm31_vm0 = vcmask 261120   ;;  %v29_v0 = vld [vmem:[#allocation2] sm:$0xff]  ;;  %v30_v1 = vld [vmem:[#allocation2 + $0x8] sm:$0xff]  ;;  %s181_s29 = smov [#allocation5]  }
  0x14   :  { %v32_v2 = vsel %vm31_vm0, %v29_v0, 0.0  ;;  %v38_v3 = vmul.f32 %v29_v0, %v29_v0  ;;  %v39_v4 = vmul.f32 %v30_v1, %v30_v1  ;;  %v35_v6 = vsel %vm31_vm0, %v30_v1, 0.0  ;;  %v116_v36 = vld [vmem:[%s245_s1] ss:$0 sm:$0xff]  ;;  %s104_s30 = sshll.u32 %s181_s29, 4  ;;  %s105_s30 = int_to_ptr.vmem [resolvable:$true] %s104_s30 }
  0x15   :  { %33 = vadd.xlane.f32.xlu0 %v32_v2  ;;  %v117_v38 = vld [vmem:[%s246_s2] ss:$0 sm:$0xff]  ;;  %s152_s1 = scalar_lea.vmem %s105_s30, 256  ;;  %p157_p9 = scmp.lt.s32.totalorder %s105_s30, %s105_s30 }
  0x16   :  { %v40_v5 = vsel %vm31_vm0, %v38_v3, 0.0  ;;  %v43_v7 = vsel %vm31_vm0, %v39_v4, 0.0  ;;  %p153_p8 = scmp.ne.s32.totalorder %s105_s30, %s152_s1  ;;  %p158_p10 = scmp.lt.s32.totalorder %s152_s1, %s152_s1 }
  0x17   :  { %41 = vadd.xlane.f32.xlu1 %v40_v5 }
  0x18   :  { %p159_p11 = por %p158_p10, %p157_p9 }
  0x19   :  { %36 = vadd.xlane.f32.xlu0 %v35_v6 }
  0x1a   :  { %p160_p12 = pnand %p159_p11, %p153_p8 }
  0x1b   :  { %44 = vadd.xlane.f32.xlu1 %v43_v7 }
  0xa2   :  { %v34_v8 = vpop.xlane.xlu0 %33 }
  0xa3   :  { %v46_v9 = vmul.f32 0.03125, %v34_v8 }
  0xa4   :  { %v42_v10 = vpop.xlane.xlu1 %41 }
  0xa5   :  { %v48_v11 = vmul.f32 %v46_v9, %v34_v8  ;;  %v77_v34 = vsub.f32 %v29_v0, %v46_v9 }
  0xa6   :  { %v37_v12 = vpop.xlane.xlu0 %36 }
  0xa7   :  { %v50_v13 = vsub.f32 %v42_v10, %v48_v11  ;;  %v47_v14 = vmul.f32 0.03125, %v37_v12 }
  0xa8   :  { %v45_v15 = vpop.xlane.xlu1 %44 }
  0xa9   :  { %v52_v16 = vmax.f32 %v50_v13, 0.0  ;;  %v49_v17 = vmul.f32 %v47_v14, %v37_v12  ;;  %v78_v40 = vsub.f32 %v30_v1, %v47_v14 }
  0xab   :  { %v55_v18 = vmul.f32 0.032258064, %v52_v16  ;;  %v51_v19 = vsub.f32 %v45_v15, %v49_v17 }
  0xad   :  { %122 = vrsqrt.f32 %v55_v18  ;;  %v53_v20 = vmax.f32 %v51_v19, 0.0  ;;  %vm59_vm1 = vcmp.eq.f32.partialorder %v55_v18, inf  ;;  %v62_v24 = vand.u32 2147483648, %v55_v18 }
  0xae   :  { %vm61_vm2 = vcmp.eq.f32.partialorder %v55_v18, 0.0 }
  0xaf   :  { %v56_v21 = vmul.f32 0.032258064, %v53_v20 }
  0xb1   :  { %124 = vrsqrt.f32 %v56_v21  ;;  %vm66_vm3 = vcmp.eq.f32.partialorder %v56_v21, inf  ;;  %v69_v30 = vand.u32 2147483648, %v56_v21  ;;  %vm68_vm4 = vcmp.eq.f32.partialorder %v56_v21, 0.0 }
  0xb7   :  { %v123_v22 = vpop.eup %122 }
  0xb8   :  { %v58_v23 = vmul.f32 %v123_v22, %v55_v18 }
  0xba   :  { %v60_v25 = vsel %vm59_vm1, %v55_v18, %v58_v23 }
  0xbb   :  { %v63_v26 = vsel %vm61_vm2, %v62_v24, %v60_v25  ;;  %v125_v27 = vpop.eup %124 }
  0xbc   :  { %v71_v28 = vadd.f32 1e-06, %v63_v26  ;;  %v65_v29 = vmul.f32 %v125_v27, %v56_v21 }
  0xbe   :  { %126 = vrcp.f32 %v71_v28  ;;  %v67_v31 = vsel %vm66_vm3, %v56_v21, %v65_v29 }
  0xbf   :  { %v70_v32 = vsel %vm68_vm4, %v69_v30, %v67_v31 }
  0xc0   :  { %v72_v33 = vadd.f32 1e-06, %v70_v32 }
  0xc2   :  { %128 = vrcp.f32 %v72_v33 }
  0xc8   :  { %v127_v35 = vpop.eup %126 }
  0xc9   :  { %v79_v37 = vmul.f32 %v127_v35, %v77_v34 }
  0xcb   :  { %v87_v39 = vmul.f32 %v116_v36, %v79_v37 }
  0xcc   :  { %v129_v41 = vpop.eup %128 }
  0xcd   :  { %v95_v42 = vadd.f32 %v117_v38, %v87_v39  ;;  %v80_v43 = vmul.f32 %v129_v41, %v78_v40 }
  0xcf   :  { %97 = vst.msk [vmem:[#allocation5] sm:$0xff] %vm31_vm0, %v95_v42  ;;  %v88_v44 = vmul.f32 %v116_v36, %v80_v43 }
  0xd1   :  { %v96_v45 = vadd.f32 %v117_v38, %v88_v44 }
  0xd3   :  { %98 = vst.msk [vmem:[#allocation5 + $0x8] sm:$0xff] %vm31_vm0, %v96_v45 }
  0xd4   :  { %163 = shalt.err (!%p160_p12)
}
  0xd5   :  { %s164_s5 = scalar_lea.hbm %s247_s3, 256 }
  0xd6   :  { %p165_p13 = scmp.ne.s32.totalorder %s247_s3, %s164_s5  ;;  %p168_p0 = scmp.lt.u32.totalorder %s164_s5, %s247_s3 }
  0xd8   :  { %p170_p1 = pnand %p168_p0, %p165_p13 }
  0xda   :  { %173 = shalt.err (!%p170_p1)
}
  0xdb   :  { %110 = dma.vmem_to_hbm [thread:$0]  %s105_s30, 256, %s247_s3, [#allocation4], %s179_s22, %s179_s22, %s180_s23  }
  0xdc   :  { %176 = dma.done.wait [#allocation4], 256  }
  0xdd   :  { %177 = vsyncadd [#allocation4], 4294967040 }
  0xde   :  { %114 = vsyncpa [#allocation3], 1 }
  0xdf   :  { %115 = vsyncpa [#allocation4], 1 }

</bundles_post_ra>
